<compile_context>
chip_gen: v7x
topology: tpu7x:2x2x1
jax: 0.10.0
libtpu: 0.0.40
codegen_flags: <defaults>
</compile_context>

<pallas_src>
import jax
import jax.numpy as jnp
from jax.experimental import pallas as pl
from jax.experimental.pallas import tpu as pltpu

# -------------------- problem sizes / TPU-friendly padding --------------------
N_NODES = 3
IN_CH, HID_CH, OUT_CH = 1, 2, 2

N_PAD = 8      # sublane-aligned node count (contraction width for A_hat)
H_PAD = 8      # padded hidden width (contraction for layer 2)
LANE = 128     # lane-dense width for all vector intermediates / outputs

# constant-slab row layout: one (SLAB_ROWS, 128) f32 array, packed once at init
ROW_A = 0                  # rows  0: 8  -> A_hat   (cols 0:8 valid)
ROW_W2 = N_PAD             # rows  8:16  -> W2      (rows 0:HID_CH valid)
ROW_W1 = 2 * N_PAD         # row  16     -> W1 row  (cols 0:HID_CH valid)
ROW_B1 = 2 * N_PAD + 1     # row  17     -> b1
ROW_B2 = 2 * N_PAD + 2     # row  18     -> b2
SLAB_ROWS = 24             # padded to a multiple of 8 sublanes


# ------------------------------- Pallas kernel -------------------------------
def gcn_kernel(x_ref, c_ref, o_ref):
    # x_ref : (N_NODES,)        f32  SMEM   raw node features (IN_CH == 1)
    # c_ref : (SLAB_ROWS, 128)  f32  VMEM   packed A_hat / W2 / W1 / b1 / b2
    # o_ref : (N_PAD, 128)      f32  VMEM
    f32 = jnp.float32

    a   = c_ref[ROW_A:ROW_A + N_PAD, :N_PAD]         # (8, 8)   zero-padded A_hat
    w2  = c_ref[ROW_W2:ROW_W2 + H_PAD, :]            # (8, 128) zero-padded W2
    w1r = c_ref[ROW_W1:ROW_W1 + 1, :]                # (1, 128) W1 row
    b1  = c_ref[ROW_B1:ROW_B1 + 1, :]                # (1, 128)
    b2  = c_ref[ROW_B2:ROW_B2 + 1, :]                # (1, 128)

    # Zero-padded feature column built from SMEM scalars; rows N_NODES..N_PAD-1 stay 0.
    rows = jax.lax.broadcasted_iota(jnp.int32, (N_PAD, LANE), 0)
    xb = jnp.zeros((N_PAD, LANE), f32)
    for n in range(N_NODES):
        xb = jnp.where(rows == n, x_ref[n], xb)

    # layer 1: relu(A_hat @ (X @ W1) + b1); X @ W1 (K=1) is a rank-1 outer product (VPU).
    h0 = xb * w1r                                                   # (8, 128)
    h = jnp.dot(a, h0, preferred_element_type=f32) + b1             # (8, 128)
    h = jnp.maximum(h, 0.0)
    # NOTE: padded rows 3..7 of h equal relu(b1); harmless because A_hat's padded
    # columns are zero, so they never reach valid output rows.

    # layer 2: A_hat @ (H @ W2) + b2  (hidden contraction uses only the first H_PAD lanes)
    g = jnp.dot(h[:, :H_PAD], w2, preferred_element_type=f32)       # (8, 128)
    o_ref[...] = jnp.dot(a, g, preferred_element_type=f32) + b2     # unmasked lane-dense store


# ------------------- one-time packing (hoisted out of per-call path) -------------------
def pack_constant_slab(a_hat, w1, b1, w2, b2):
    """Pack all constant operands into one (SLAB_ROWS, 128) f32 slab (single DMA)."""
    f32 = jnp.float32
    c = jnp.zeros((SLAB_ROWS, LANE), f32)
    c = c.at[ROW_A:ROW_A + N_NODES, :N_NODES].set(a_hat.astype(f32))
    c = c.at[ROW_W2:ROW_W2 + HID_CH, :OUT_CH].set(w2.astype(f32))
    c = c.at[ROW_W1, :HID_CH].set(w1.reshape(-1).astype(f32))
    c = c.at[ROW_B1, :HID_CH].set(b1.astype(f32))
    c = c.at[ROW_B2, :OUT_CH].set(b2.astype(f32))
    return c


# ------------------------------- per-call forward -------------------------------
_COST = pl.CostEstimate(
    flops=2 * N_PAD * N_PAD * LANE * 3 + 4 * N_PAD * LANE,
    transcendentals=0,
    bytes_accessed=SLAB_ROWS * LANE * 4 + N_NODES * 4 + N_PAD * LANE * 4,
)


@jax.jit
def gcn_forward_pallas(x, const_slab):
    # no per-call padding: raw features go straight to SMEM, kernel pads internally
    x_flat = x.reshape(-1).astype(jnp.float32)           # (N_NODES,)
    out_p = pl.pallas_call(
        gcn_kernel,
        out_shape=jax.ShapeDtypeStruct((N_PAD, LANE), jnp.float32),
        in_specs=[pl.BlockSpec(memory_space=pltpu.MemorySpace.SMEM),
                  pl.BlockSpec(memory_space=pltpu.MemorySpace.VMEM)],
        out_specs=pl.BlockSpec(memory_space=pltpu.MemorySpace.VMEM),
        cost_estimate=_COST,
    )(x_flat, const_slab)
    return out_p[:N_NODES, :OUT_CH]


# ------------------------ graph preprocessing (glue) ------------------------
def build_normalized_adjacency(edge_index, num_nodes):
    """Dense A_hat = D^-1/2 (A + I) D^-1/2, matching PyG GCNConv's gcn_norm."""
    src, dst = edge_index[0], edge_index[1]
    adj = jnp.zeros((num_nodes, num_nodes), jnp.float32)
    adj = adj.at[dst, src].add(1.0)                       # message j -> i lands in row i
    adj = adj + jnp.eye(num_nodes, dtype=jnp.float32)     # self loops
    deg = adj.sum(axis=1)
    dinv = jnp.where(deg > 0, 1.0 / jnp.sqrt(deg), 0.0)
    return dinv[:, None] * adj * dinv[None, :]


# --------------------------- pure-JAX reference ------------------------------
def gcn_forward_ref(a_hat, x, w1, b1, w2, b2):
    h = jnp.maximum(a_hat @ (x @ w1) + b1, 0.0)
    return a_hat @ (h @ w2) + b2


if __name__ == "__main__":
    # graph from the module definition
    edge_index = jnp.array([[0, 1, 1, 2], [1, 0, 2, 1]], dtype=jnp.int32)
    x = jnp.array([[1.0], [2.0], [3.0]], dtype=jnp.float32)

    # deterministic parameter init (shapes of GCNConv(1,2) and GCNConv(2,2))
    key = jax.random.PRNGKey(0)
    k1, k2, k3, k4 = jax.random.split(key, 4)
    w1 = jax.random.normal(k1, (IN_CH, HID_CH), jnp.float32) * 0.5
    b1 = jax.random.normal(k2, (HID_CH,), jnp.float32) * 0.1
    w2 = jax.random.normal(k3, (HID_CH, OUT_CH), jnp.float32) * 0.5
    b2 = jax.random.normal(k4, (OUT_CH,), jnp.float32) * 0.1

    a_hat = build_normalized_adjacency(edge_index, N_NODES)
    const_slab = pack_constant_slab(a_hat, w1, b1, w2, b2)   # packed once, reused per call

    out = gcn_forward_pallas(x, const_slab)
    out = jax.block_until_ready(out)

    ref = gcn_forward_ref(a_hat, x, w1, b1, w2, b2)
    assert out.shape == (N_NODES, OUT_CH)
    assert jnp.allclose(out, ref, atol=1e-3, rtol=1e-3), (out, ref)

    print("KERNEL_OK")
</pallas_src>

<mosaic_0001>
module attributes {stable_mosaic.version = 11 : i64} {
  func.func @gcn_kernel(%arg0: memref<3xf32, #tpu.memory_space<smem>>, %arg1: memref<24x128xf32, #tpu.memory_space<vmem>>, %arg2: memref<8x128xf32, #tpu.memory_space<vmem>>) attributes {dimension_semantics = [], scalar_prefetch = 0 : i64, scratch_operands = 0 : i64, tpu.core_type = #tpu.core_type<tc>} {
    %c0 = arith.constant 0 : index
    %c0_0 = arith.constant 0 : index
    %0 = vector.load %arg1[%c0, %c0_0] : memref<24x128xf32, #tpu.memory_space<vmem>>, vector<8x8xf32>
    %c8 = arith.constant 8 : index
    %c0_1 = arith.constant 0 : index
    %1 = vector.load %arg1[%c8, %c0_1] : memref<24x128xf32, #tpu.memory_space<vmem>>, vector<8x128xf32>
    %c16 = arith.constant 16 : index
    %c0_2 = arith.constant 0 : index
    %2 = vector.load %arg1[%c16, %c0_2] : memref<24x128xf32, #tpu.memory_space<vmem>>, vector<1x128xf32>
    %c17 = arith.constant 17 : index
    %c0_3 = arith.constant 0 : index
    %3 = vector.load %arg1[%c17, %c0_3] : memref<24x128xf32, #tpu.memory_space<vmem>>, vector<1x128xf32>
    %c18 = arith.constant 18 : index
    %c0_4 = arith.constant 0 : index
    %4 = vector.load %arg1[%c18, %c0_4] : memref<24x128xf32, #tpu.memory_space<vmem>>, vector<1x128xf32>
    %5 = tpu.iota {dimensions = array<i32: 0>} : vector<8x128xi32>
    %cst = arith.constant 0.000000e+00 : f32
    %6 = vector.broadcast %cst : f32 to vector<8x128xf32>
    %c0_i32 = arith.constant 0 : i32
    %7 = vector.broadcast %c0_i32 : i32 to vector<8x128xi32>
    %8 = arith.cmpi eq, %5, %7 : vector<8x128xi32>
    %c0_5 = arith.constant 0 : index
    %9 = memref.load %arg0[%c0_5] : memref<3xf32, #tpu.memory_space<smem>>
    %10 = vector.broadcast %9 : f32 to vector<8x128xf32>
    %11 = arith.select %8, %10, %6 : vector<8x128xi1>, vector<8x128xf32>
    %c1_i32 = arith.constant 1 : i32
    %12 = vector.broadcast %c1_i32 : i32 to vector<8x128xi32>
    %13 = arith.cmpi eq, %5, %12 : vector<8x128xi32>
    %c1 = arith.constant 1 : index
    %14 = memref.load %arg0[%c1] : memref<3xf32, #tpu.memory_space<smem>>
    %15 = vector.broadcast %14 : f32 to vector<8x128xf32>
    %16 = arith.select %13, %15, %11 : vector<8x128xi1>, vector<8x128xf32>
    %c2_i32 = arith.constant 2 : i32
    %17 = vector.broadcast %c2_i32 : i32 to vector<8x128xi32>
    %18 = arith.cmpi eq, %5, %17 : vector<8x128xi32>
    %c2 = arith.constant 2 : index
    %19 = memref.load %arg0[%c2] : memref<3xf32, #tpu.memory_space<smem>>
    %20 = vector.broadcast %19 : f32 to vector<8x128xf32>
    %21 = arith.select %18, %20, %16 : vector<8x128xi1>, vector<8x128xf32>
    %22 = vector.broadcast %2 : vector<1x128xf32> to vector<8x128xf32>
    %23 = arith.mulf %21, %22 : vector<8x128xf32>
    %cst_6 = arith.constant dense<0.000000e+00> : vector<8x128xf32>
    %24 = tpu.matmul %0, %23, %cst_6 {dimension_numbers = #tpu.dot_dimension_numbers<[1], [0], [0], [1], [0, 0, 1, 1], [], []>} : vector<8x8xf32>, vector<8x128xf32>, vector<8x128xf32> -> vector<8x128xf32>
    %25 = vector.broadcast %3 : vector<1x128xf32> to vector<8x128xf32>
    %26 = arith.addf %24, %25 : vector<8x128xf32>
    %cst_7 = arith.constant 0.000000e+00 : f32
    %27 = vector.broadcast %cst_7 : f32 to vector<8x128xf32>
    %28 = arith.maximumf %26, %27 : vector<8x128xf32>
    %29 = vector.extract_strided_slice %28 {offsets = [0, 0], sizes = [8, 8], strides = [1, 1]} : vector<8x128xf32> to vector<8x8xf32>
    %cst_8 = arith.constant dense<0.000000e+00> : vector<8x128xf32>
    %30 = tpu.matmul %29, %1, %cst_8 {dimension_numbers = #tpu.dot_dimension_numbers<[1], [0], [0], [1], [0, 0, 1, 1], [], []>} : vector<8x8xf32>, vector<8x128xf32>, vector<8x128xf32> -> vector<8x128xf32>
    %cst_9 = arith.constant dense<0.000000e+00> : vector<8x128xf32>
    %31 = tpu.matmul %0, %30, %cst_9 {dimension_numbers = #tpu.dot_dimension_numbers<[1], [0], [0], [1], [0, 0, 1, 1], [], []>} : vector<8x8xf32>, vector<8x128xf32>, vector<8x128xf32> -> vector<8x128xf32>
    %32 = vector.broadcast %4 : vector<1x128xf32> to vector<8x128xf32>
    %33 = arith.addf %31, %32 : vector<8x128xf32>
    %c0_10 = arith.constant 0 : index
    %c0_11 = arith.constant 0 : index
    %34 = vector.load %arg2[%c0_10, %c0_11] : memref<8x128xf32, #tpu.memory_space<vmem>>, vector<8x128xf32>
    tpu.vector_store %arg2[%c0_10, %c0_11], %33 {strides = array<i32>} : memref<8x128xf32, #tpu.memory_space<vmem>>, vector<8x128xf32>,
    return
  }
}

</mosaic_0001>

<bundles_post_ra>
// kernel: gcn_forward_pallas.1
= control target key start
LH: loop header
LB: loop body
LE: loop exit
PB: predicated region body
PF: predicated region fallthrough
CT: control target
= control target key end

     0   :  { %7 = vsyncpa [#allocation4], 0  ;;  %s413_s0 = inlined_call_operand.vmem [shape: f32[3], index: 0, kind: input, shape index: {}]   ;;  %s414_s1 = inlined_call_operand.hbm [shape: f32[24,128], index: 1, kind: input, shape index: {}]   ;;  %s415_s2 = inlined_call_operand.vmem [shape: f32[8,128], index: 2, kind: output, shape index: {}]  }
   0x1   :  { %s15_s11 = sshll.u32 %s413_s0, 4  ;;  %s16_s11 = int_to_ptr.vmem [resolvable:$true] %s15_s11 }
   0x2   :  { %8 = vsyncpa [#allocation3], 0  ;;  %s330_s12 = scalar_lea.vmem %s16_s11, 16  ;;  %p335_p1 = scmp.lt.s32.totalorder %s16_s11, %s16_s11 }
   0x3   :  { %p331_p0 = scmp.ne.s32.totalorder %s16_s11, %s330_s12  ;;  %p336_p2 = scmp.lt.s32.totalorder %s330_s12, %s330_s12 }
   0x5   :  { %p337_p3 = por %p336_p2, %p335_p1 }
   0x7   :  { %p338_p4 = pnand %p337_p3, %p331_p0 }
   0x9   :  { %341 = shalt.err (!%p338_p4)
}
   0xa   :  { %s368_s13 = smov [#allocation2]   ;;  %s369_s14 = smov [#allocation5]  }
   0xb   :  { %18 = dma.vmem_to_smem %s16_s11, 16, %s368_s13, [#allocation4]  }
   0xc   :  { %s24_s15 = sshll.u32 %s369_s14, 4  ;;  %s342_s18 = scalar_lea.hbm %s414_s1, 384  ;;  %s25_s15 = int_to_ptr.vmem [resolvable:$true] %s24_s15 }
   0xd   :  { %p343_p5 = scmp.ne.s32.totalorder %s414_s1, %s342_s18  ;;  %p346_p6 = scmp.lt.u32.totalorder %s342_s18, %s414_s1 }
   0xf   :  { %p348_p7 = pnand %p346_p6, %p343_p5 }
  0x11   :  { %351 = shalt.err (!%p348_p7)
}
  0x12   :  { %s352_s22 = scalar_lea.vmem %s25_s15, 384  ;;  %p357_p9 = scmp.lt.s32.totalorder %s25_s15, %s25_s15 }
  0x13   :  { %p353_p8 = scmp.ne.s32.totalorder %s25_s15, %s352_s22  ;;  %p358_p10 = scmp.lt.s32.totalorder %s352_s22, %s352_s22 }
  0x15   :  { %p359_p11 = por %p358_p10, %p357_p9 }
  0x17   :  { %p360_p12 = pnand %p359_p11, %p353_p8 }
  0x19   :  { %363 = shalt.err (!%p360_p12)
}
  0x1a   :  { %s370_s23 = smov 128   ;;  %s371_s24 = smov 8  }
  0x1b   :  { %30 = dma.hbm_to_vmem [thread:$0]  %s414_s1, 384, %s25_s15, [#allocation3], %s370_s23, %s370_s23, %s371_s24  }
  0x1c   :  { %364 = dma.done.wait [#allocation4], 16  }
  0x1d   :  { %365 = vsyncadd [#allocation4], 4294967280 }
  0x1e   :  { %366 = dma.done.wait [#allocation3], 384  }
  0x1f   :  { %367 = vsyncadd [#allocation3], 4294966912 }
  0x20   :  { %37 = sfence }
  0x21   :  { %v43_v0 = vlaneseq  ;;  %s46_s27 = sld [smem:[#allocation2]]  ;;  %v372_v1 = vmov 0.0   ;;  %s295_s28 = sld [smem:[#allocation2 + $0x1]]  ;;  %vm373_vm0 = vmmov 0   ;;  %v297_v4 = vld [vmem:[#allocation5 + $0x10] ss:$0 sm:$0xff] }
  0x22   :  { %309 = vmatprep.subr.mxu0 %v372_v1  ;;  %s296_s29 = sld [smem:[#allocation2 + $0x2]]  ;;  %311 = vmatprep.mubr.msk.f32.mxu0 %vm373_vm0, %v372_v1  ;;  %v38_v11 = vld [vmem:[#allocation5] sm:$0xff]  ;;  %vm66_vm4 = vcmask 64512   ;;  %v39_v12 = vld [vmem:[#allocation5 + $0x8] sm:$0xff]  ;;  %v298_v13 = vld [vmem:[#allocation5 + $0x11] ss:$0 sm:$0xff] }
  0x23   :  { %v44_v2 = vshrl.u32 %v43_v0, 7  ;;  %314 = vmatprep.subr.mxu1 %v372_v1  ;;  %316 = vmatprep.mubr.msk.f32.mxu1 %vm373_vm0, %v372_v1  ;;  %v301_v20 = vld [vmem:[#allocation5 + $0x12] ss:$0 sm:$0xff] }
  0x24   :  { %315 = vmatpush3.msra.mxu1 %v39_v12 }
  0x25   :  { %vm45_vm1 = vcmp.eq.s32.totalorder %v44_v2, 0  ;;  %vm49_vm2 = vcmp.eq.s32.totalorder %v44_v2, 1  ;;  %vm53_vm3 = vcmp.eq.s32.totalorder %v44_v2, 2 }
  0x27   :  { %v47_v3 = vstv %s46_s27  ;;  %v51_v6 = vstv %s295_s28 }
  0x28   :  { %v48_v5 = vsel %vm45_vm1, %v47_v3, 0.0  ;;  %v55_v7 = vstv %s296_s29 }
  0x29   :  { %v52_v8 = vsel %vm49_vm2, %v51_v6, %v48_v5 }
  0x2a   :  { %v56_v9 = vsel %vm53_vm3, %v55_v7, %v52_v8 }
  0x2b   :  { %v61_v10 = vmul.f32 %v297_v4, %v56_v9 }
  0x2d   :  { %310 = vmatpush3.msra.mxu0 %v61_v10 }
  0x2e   :  { %312 = vmatmul.mubr.msk.f32.vlgmr.msra.gmra.mrb[0].mxu0 %vm66_vm4, %v38_v11  ;;  %319 = vmatprep.subr.mxu0 %v372_v1 }
  0x2f   :  { %321 = vmatprep.mubr.msk.f32.mxu0 %vm373_vm0, %v372_v1 }
 0x101   :  { %v136_v14 = vpop.f32.mrb[0].mxu0 }
 0x102   :  { %v137_v15 = vadd.f32 %v298_v13, %v136_v14  ;;  %v313_v16 = vpop.f32.mrb[1].mxu0 }
 0x104   :  { %v140_v17 = vmax.f32 %v137_v15, 0.0 }
 0x106   :  { %317 = vmatmul.mubr.msk.f32.vlgmr.msra.gmra.mrb[0].mxu1 %vm66_vm4, %v140_v17 }
 0x1d9   :  { %v210_v18 = vpop.f32.mrb[0].mxu1 }
 0x1da   :  { %v318_v19 = vpop.f32.mrb[1].mxu1  ;;  %320 = vmatpush3.msra.mxu0 %v210_v18 }
 0x1db   :  { %322 = vmatmul.mubr.msk.f32.vlgmr.msra.gmra.mrb[2].mxu0 %vm66_vm4, %v38_v11 }
 0x2ae   :  { %v284_v21 = vpop.f32.mrb[2].mxu0 }
 0x2af   :  { %v285_v22 = vadd.f32 %v301_v20, %v284_v21  ;;  %v323_v23 = vpop.f32.mrb[3].mxu0 }
 0x2b1   :  { %288 = vst [vmem:[%s415_s2] sm:$0xff] %v285_v22 }
 0x2b2   :  { %293 = vsyncpa [#allocation3], 1 }
 0x2b3   :  { %294 = vsyncpa [#allocation4], 1 }

</bundles_post_ra>
